<compile_context>
chip_gen: v7x
topology: tpu7x:2x2x1
jax: 0.10.0
libtpu: 0.0.40
codegen_flags: <defaults>
</compile_context>

<pallas_src>
import jax
import jax.numpy as jnp
from jax.experimental import pallas as pl
from jax.experimental.pallas import tpu as pltpu


# ----------------------------------------------------------------------------
# Stage 1: channel-attention MLP (runs once, tiny).
# ----------------------------------------------------------------------------
def _mlp_kernel(label_ref, w1t_ref, w2t_ref, attn_ref, gate_ref):
    label = label_ref[...]                                    # (B, C1)
    h = jnp.dot(label, w1t_ref[...],
                preferred_element_type=jnp.float32)           # (B, C0)
    h = jnp.maximum(h, 0.0)                                   # ReLU
    attn = jnp.dot(h, w2t_ref[...],
                   preferred_element_type=jnp.float32)        # (B, C0)
    attn_ref[...] = attn.astype(attn_ref.dtype)
    gate = jax.nn.sigmoid(attn)                               # (B, C0)
    gate_ref[...] = gate[:, :, None].astype(gate_ref.dtype)   # (B, C0, 1)


# ----------------------------------------------------------------------------
# Stage 2: per-channel gating of the feature map (memory-bound hot loop).
# feats tile: (1, C0_TILE, HW_TILE); gate tile: (1, C0_TILE, 1).
# ----------------------------------------------------------------------------
def _gate_kernel(feats_ref, gate_ref, out_ref):
    out_ref[...] = (feats_ref[...] * gate_ref[...]).astype(out_ref.dtype)


def _largest_tile(total, quantum, max_tile):
    """Largest multiple of `quantum` that divides `total` and is <= max_tile.

    Falls back to the full extent (which always satisfies the TPU block-shape
    rule) if no such divisor exists.
    """
    if total <= max_tile:
        return total
    best = None
    d = quantum
    while d <= max_tile:
        if total % d == 0:
            best = d
        d += quantum
    return best if best is not None else total


def label_attention_forward(feats, label, w1, w2):
    """feats: (B, C0, H, W) float32 (NCHW); label: (B, C1);
    w1: (C0, C1) = conv1 weight with 1x1 spatial dims squeezed;
    w2: (C0, C0) = conv2 weight squeezed.
    Returns (ch_attn (B, C0), gated feats (B, C0, H, W))."""
    B, C0, H, W = feats.shape
    _, C1 = label.shape
    HW = H * W
    feats_flat = feats.reshape(B, C0, HW)
    w1t = w1.T  # (C1, C0)
    w2t = w2.T  # (C0, C0)

    # ---- Stage 1: one-shot MLP + sigmoid gate --------------------------------
    attn, gate = pl.pallas_call(
        _mlp_kernel,
        out_shape=(
            jax.ShapeDtypeStruct((B, C0), feats.dtype),
            jax.ShapeDtypeStruct((B, C0, 1), jnp.float32),
        ),
        grid=(1,),
        in_specs=[
            pl.BlockSpec((B, C1), lambda i: (0, 0)),
            pl.BlockSpec((C1, C0), lambda i: (0, 0)),
            pl.BlockSpec((C0, C0), lambda i: (0, 0)),
        ],
        out_specs=(
            pl.BlockSpec((B, C0), lambda i: (0, 0)),
            pl.BlockSpec((B, C0, 1), lambda i: (0, 0, 0)),
        ),
        compiler_params=pltpu.CompilerParams(
            dimension_semantics=("arbitrary",)),
    )(label, w1t, w2t)

    # ---- Stage 2: tiled, pipelined gating ------------------------------------
    C0_TILE = _largest_tile(C0, 8, 256)
    # Keep one f32 feats tile around ~2 MiB so (2 in + 2 out) double buffers
    # stay far below the scoped VMEM limit on every generation (incl. v7x).
    hw_budget = max(512, (2 * 1024 * 1024) // (4 * C0_TILE))
    hw_budget = max(128, (hw_budget // 128) * 128)
    HW_TILE = _largest_tile(HW, 128, hw_budget)

    grid = (B, C0 // C0_TILE, HW // HW_TILE)

    out_flat = pl.pallas_call(
        _gate_kernel,
        out_shape=jax.ShapeDtypeStruct((B, C0, HW), feats.dtype),
        grid=grid,
        in_specs=[
            pl.BlockSpec((1, C0_TILE, HW_TILE), lambda b, c, s: (b, c, s)),
            pl.BlockSpec((1, C0_TILE, 1), lambda b, c, s: (b, c, 0)),
        ],
        out_specs=pl.BlockSpec((1, C0_TILE, HW_TILE),
                               lambda b, c, s: (b, c, s)),
        compiler_params=pltpu.CompilerParams(
            dimension_semantics=("parallel", "parallel", "parallel"),
            vmem_limit_bytes=32 * 1024 * 1024),
    )(feats_flat, gate)

    return attn, out_flat.reshape(B, C0, H, W)


if __name__ == "__main__":
    # in_c = [C0, C1]: label has C1 channels, feats has C0 channels.
    B, C0, C1, H, W = 2, 32, 64, 16, 16

    key = jax.random.PRNGKey(0)
    k_feats, k_label, k_w1, k_w2 = jax.random.split(key, 4)
    feats = jax.random.normal(k_feats, (B, C0, H, W), jnp.float32)
    label = jax.random.normal(k_label, (B, C1), jnp.float32)
    # Conv2d(..., kernel_size=1, bias=False) weights with 1x1 dims squeezed:
    # stored as (out_ch, in_ch).
    w1 = jax.random.normal(k_w1, (C0, C1), jnp.float32) * 0.1
    w2 = jax.random.normal(k_w2, (C0, C0), jnp.float32) * 0.1

    ch_attn, feats_out = label_attention_forward(feats, label, w1, w2)
    jax.block_until_ready((ch_attn, feats_out))

    # Plain-JAX reference check of the forward semantics.
    h_ref = jnp.maximum(label @ w1.T, 0.0)
    attn_ref = h_ref @ w2.T
    out_ref = feats * jax.nn.sigmoid(attn_ref)[:, :, None, None]
    assert ch_attn.shape == (B, C0) and feats_out.shape == (B, C0, H, W)
    assert jnp.allclose(ch_attn, attn_ref, atol=1e-5, rtol=1e-5)
    assert jnp.allclose(feats_out, out_ref, atol=1e-5, rtol=1e-5)

    print("KERNEL_OK")
</pallas_src>

<mosaic_0001>
module attributes {stable_mosaic.version = 11 : i64} {
  func.func @_mlp_kernel(%arg0: i32, %arg1: memref<2x64xf32, #tpu.memory_space<vmem>>, %arg2: memref<64x32xf32, #tpu.memory_space<vmem>>, %arg3: memref<32x32xf32, #tpu.memory_space<vmem>>, %arg4: memref<2x32xf32, #tpu.memory_space<vmem>>, %arg5: memref<2x32x1xf32, #tpu.memory_space<vmem>>) attributes {dimension_semantics = [#tpu.dimension_semantics<arbitrary>], iteration_bounds = array<i64: 1>, scalar_prefetch = 0 : i64, scratch_operands = 0 : i64, tpu.core_type = #tpu.core_type<tc>, window_params = [{pipeline_mode = #tpu.pipeline_mode<synchronous>, transform_indices = @transform_0, window_bounds = array<i64: 2, 64>}, {pipeline_mode = #tpu.pipeline_mode<synchronous>, transform_indices = @transform_1, window_bounds = array<i64: 64, 32>}, {pipeline_mode = #tpu.pipeline_mode<synchronous>, transform_indices = @transform_2, window_bounds = array<i64: 32, 32>}, {pipeline_mode = #tpu.pipeline_mode<synchronous>, transform_indices = @transform_3, window_bounds = array<i64: 2, 32>}, {pipeline_mode = #tpu.pipeline_mode<synchronous>, transform_indices = @transform_4, window_bounds = array<i64: 2, 32, 1>}]} {
    %c0 = arith.constant 0 : index
    %c0_0 = arith.constant 0 : index
    %0 = vector.load %arg1[%c0, %c0_0] : memref<2x64xf32, #tpu.memory_space<vmem>>, vector<2x64xf32>
    %c0_1 = arith.constant 0 : index
    %c0_2 = arith.constant 0 : index
    %1 = vector.load %arg2[%c0_1, %c0_2] : memref<64x32xf32, #tpu.memory_space<vmem>>, vector<64x32xf32>
    %cst = arith.constant dense<0.000000e+00> : vector<2x32xf32>
    %2 = tpu.matmul %0, %1, %cst {dimension_numbers = #tpu.dot_dimension_numbers<[1], [0], [0], [1], [0, 0, 1, 1], [], []>} : vector<2x64xf32>, vector<64x32xf32>, vector<2x32xf32> -> vector<2x32xf32>
    %cst_3 = arith.constant 0.000000e+00 : f32
    %3 = vector.broadcast %cst_3 : f32 to vector<2x32xf32>
    %4 = arith.maximumf %2, %3 : vector<2x32xf32>
    %c0_4 = arith.constant 0 : index
    %c0_5 = arith.constant 0 : index
    %5 = vector.load %arg3[%c0_4, %c0_5] : memref<32x32xf32, #tpu.memory_space<vmem>>, vector<32x32xf32>
    %cst_6 = arith.constant dense<0.000000e+00> : vector<2x32xf32>
    %6 = tpu.matmul %4, %5, %cst_6 {dimension_numbers = #tpu.dot_dimension_numbers<[1], [0], [0], [1], [0, 0, 1, 1], [], []>} : vector<2x32xf32>, vector<32x32xf32>, vector<2x32xf32> -> vector<2x32xf32>
    %c0_7 = arith.constant 0 : index
    %c0_8 = arith.constant 0 : index
    %7 = vector.load %arg4[%c0_7, %c0_8] : memref<2x32xf32, #tpu.memory_space<vmem>>, vector<2x32xf32>
    tpu.vector_store %arg4[%c0_7, %c0_8], %6 {strides = array<i32>} : memref<2x32xf32, #tpu.memory_space<vmem>>, vector<2x32xf32>,
    %8 = arith.negf %6 : vector<2x32xf32>
    %9 = math.exp %8 : vector<2x32xf32>
    %cst_9 = arith.constant 1.000000e+00 : f32
    %10 = vector.broadcast %cst_9 : f32 to vector<2x32xf32>
    %11 = arith.addf %10, %9 : vector<2x32xf32>
    %12 = arith.divf %10, %11 : vector<2x32xf32>
    %13 = vector.shape_cast %12 : vector<2x32xf32> to vector<2x32x1xf32>
    %c0_10 = arith.constant 0 : index
    %c0_11 = arith.constant 0 : index
    %c0_12 = arith.constant 0 : index
    %14 = vector.load %arg5[%c0_10, %c0_11, %c0_12] : memref<2x32x1xf32, #tpu.memory_space<vmem>>, vector<2x32x1xf32>
    tpu.vector_store %arg5[%c0_10, %c0_11, %c0_12], %13 {strides = array<i32>} : memref<2x32x1xf32, #tpu.memory_space<vmem>>, vector<2x32x1xf32>,
    return
  }
  func.func @transform_0(%arg0: i32) -> (i32, i32) {
    %c0_i32 = arith.constant 0 : i32
    %c0_i32_0 = arith.constant 0 : i32
    %c0_i32_1 = arith.constant 0 : i32
    return %c0_i32, %c0_i32_0 : i32, i32
  }
  func.func @transform_1(%arg0: i32) -> (i32, i32) {
    %c0_i32 = arith.constant 0 : i32
    %c0_i32_0 = arith.constant 0 : i32
    %c0_i32_1 = arith.constant 0 : i32
    return %c0_i32, %c0_i32_0 : i32, i32
  }
  func.func @transform_2(%arg0: i32) -> (i32, i32) {
    %c0_i32 = arith.constant 0 : i32
    %c0_i32_0 = arith.constant 0 : i32
    %c0_i32_1 = arith.constant 0 : i32
    return %c0_i32, %c0_i32_0 : i32, i32
  }
  func.func @transform_3(%arg0: i32) -> (i32, i32) {
    %c0_i32 = arith.constant 0 : i32
    %c0_i32_0 = arith.constant 0 : i32
    %c0_i32_1 = arith.constant 0 : i32
    return %c0_i32, %c0_i32_0 : i32, i32
  }
  func.func @transform_4(%arg0: i32) -> (i32, i32, i32) {
    %c0_i32 = arith.constant 0 : i32
    %c0_i32_0 = arith.constant 0 : i32
    %c0_i32_1 = arith.constant 0 : i32
    %c0_i32_2 = arith.constant 0 : i32
    return %c0_i32, %c0_i32_0, %c0_i32_1 : i32, i32, i32
  }
}

</mosaic_0001>

<bundles_post_ra>
// kernel: tpu_custom_call.1
= control target key start
LH: loop header
LB: loop body
LE: loop exit
PB: predicated region body
PF: predicated region fallthrough
CT: control target
= control target key end

     0   :  { %v349_v3 = vmov 0.0|0.0   ;;  %vm350_vm0 = vmmov 0   ;;  %v351_v6 = vmov 0.0   ;;  %s461_s0 = inlined_call_operand.vmem [shape: f32[2,64], index: 0, kind: input, shape index: {}]   ;;  %s462_s1 = inlined_call_operand.vmem [shape: f32[64,32], index: 1, kind: input, shape index: {}]   ;;  %s463_s2 = inlined_call_operand.vmem [shape: f32[32,32], index: 2, kind: input, shape index: {}]   ;;  %s464_s3 = inlined_call_operand.hbm [shape: f32[2,32], index: 3, kind: output, shape index: {0}]   ;;  %s465_s4 = inlined_call_operand.vmem [shape: f32[2,32,1], index: 4, kind: output, shape index: {1}]  }
   0x1   :  { %v18_v0 = vld [vmem:[%s462_s1] sm:$0xff]  ;;  %v19_v1 = vld [vmem:[%s462_s1 + $0x8] sm:$0xff]  ;;  %v20_v2 = vld [vmem:[%s462_s1 + $0x10] sm:$0xff]  ;;  %299 = vmatprep.subr.bf16.mxu0 %v349_v3  ;;  %285 = vmatprep.mubr.msk.f32.mxu0 %vm350_vm0, %v351_v6 }
   0x2   :  { %v300_v4 = vpack.c.bf16 %v19_v1, %v18_v0  ;;  %v21_v5 = vld [vmem:[%s462_s1 + $0x18] sm:$0xff]  ;;  %311 = vmatprep.subr.bf16.mxu1 %v349_v3  ;;  %296 = vmatprep.mubr.msk.f32.mxu1 %vm350_vm0, %v351_v6  ;;  %v101_v8 = vld [vmem:[%s463_s2] sm:$0xff]  ;;  %v102_v9 = vld [vmem:[%s463_s2 + $0x8] sm:$0xff] }
   0x3   :  { %v303_v7 = vpack.c.bf16 %v21_v5, %v20_v2 }
   0x4   :  { %301 = vmatpush3.bf16.msra.mxu0 %v300_v4 }
   0x5   :  { %10 = vsyncpa [#allocation3], 0  ;;  %302 = vmatprep.subr.bf16.mxu0 %v349_v3  ;;  %v22_v10 = vld [vmem:[%s462_s1 + $0x20] sm:$0xff]  ;;  %v23_v11 = vld [vmem:[%s462_s1 + $0x28] sm:$0xff]  ;;  %v312_v12 = vpack.c.bf16 %v102_v9, %v101_v8  ;;  %vm26_vm1 = vcmask 523264   ;;  %vm105_vm2 = vcmask 261120   ;;  %v187_v29 = vlaneseq }
   0x6   :  { %v306_v13 = vpack.c.bf16 %v23_v11, %v22_v10  ;;  %v24_v14 = vld [vmem:[%s462_s1 + $0x30] sm:$0xff]  ;;  %v25_v15 = vld [vmem:[%s462_s1 + $0x38] sm:$0xff]  ;;  %v17_v17 = vld [vmem:[%s461_s0] sm:$0x3]  ;;  %vm179_vm3 = vcmask 254976   ;;  %s352_s0 = smov [#allocation2]  }
   0x7   :  { %313 = vmatpush3.bf16.msra.mxu1 %v312_v12  ;;  %v309_v16 = vpack.c.bf16 %v25_v15, %v24_v14  ;;  %v103_v18 = vld [vmem:[%s463_s2 + $0x10] sm:$0xff]  ;;  %v104_v19 = vld [vmem:[%s463_s2 + $0x18] sm:$0xff]  ;;  %v188_v30 = vshrl.u32 %v187_v29, 7  ;;  %s240_s1 = sshll.u32 %s352_s0, 4  ;;  %s241_s1 = int_to_ptr.vmem [resolvable:$true] %s240_s1 }
   0x8   :  { %304 = vmatpush3.bf16.msra.mxu0 %v303_v7  ;;  %314 = vmatprep.subr.bf16.mxu1 %v349_v3  ;;  %v315_v20 = vpack.c.bf16 %v104_v19, %v103_v18  ;;  %s325_s2 = scalar_lea.vmem %s241_s1, 32  ;;  %p330_p1 = scmp.lt.s32.totalorder %s241_s1, %s241_s1 }
   0x9   :  { %305 = vmatprep.subr.bf16.mxu0 %v349_v3  ;;  %v189_v31 = vsub.s32 0, %v188_v30  ;;  %p326_p0 = scmp.ne.s32.totalorder %s241_s1, %s325_s2  ;;  %p331_p2 = scmp.lt.s32.totalorder %s325_s2, %s325_s2 }
   0xb   :  { %316 = vmatpush3.bf16.msra.mxu1 %v315_v20  ;;  %p332_p3 = por %p331_p2, %p330_p1 }
   0xc   :  { %307 = vmatpush3.bf16.msra.mxu0 %v306_v13 }
   0xd   :  { %308 = vmatprep.subr.bf16.mxu0 %v349_v3  ;;  %p333_p4 = pnand %p332_p3, %p326_p0 }
  0x10   :  { %310 = vmatpush3.bf16.msra.mxu0 %v309_v16 }
  0x13   :  { %286 = vmatmul.mubr.msk.f32.vlgmr.msra.gmra.mrb[0].mxu0 %vm26_vm1, %v17_v17 }
  0xe6   :  { %v96_v21 = vpop.f32.mrb[0].mxu0 }
  0xe7   :  { %v100_v22 = vmax.f32 %v96_v21, 0.0  ;;  %v287_v23 = vpop.f32.mrb[1].mxu0 }
  0xe9   :  { %297 = vmatmul.mubr.msk.f32.vlgmr.msra.gmra.mrb[0].mxu1 %vm105_vm2, %v100_v22 }
 0x1bc   :  { %v175_v24 = vpop.f32.mrb[0].mxu1 }
 0x1bd   :  { %v254_v25 = vmul.f32 -1.442695, %v175_v24  ;;  %v298_v26 = vpop.f32.mrb[1].mxu1  ;;  %180 = vst.msk [vmem:[#allocation2] sm:$0x3] %vm179_vm3, %v175_v24 }
 0x1bf   :  { %321 = vpow2.f32 %v254_v25 }
 0x1c9   :  { %v322_v27 = vpop.eup %321 }
 0x1ca   :  { %v184_v28 = vadd.f32 1.0, %v322_v27 }
 0x1cc   :  { %323 = vrcp.f32 %v184_v28 }
 0x1d6   :  { %v324_v32 = vpop.eup %323 }
 0x1d7   :  { %v190_v33 = vrot.slane %v324_v32, %v189_v31 }
 0x1d8   :  { %336 = shalt.err (!%p333_p4)
}
 0x1d9   :  { %s337_s17 = scalar_lea.hbm %s464_s3, 32 }
 0x1da   :  { %p338_p5 = scmp.ne.s32.totalorder %s464_s3, %s337_s17  ;;  %p341_p6 = scmp.lt.u32.totalorder %s337_s17, %s464_s3 }
 0x1dc   :  { %p343_p7 = pnand %p341_p6, %p338_p5 }
 0x1de   :  { %346 = shalt.err (!%p343_p7)
}
 0x1df   :  { %243 = dma.vmem_to_hbm [thread:$0]  %s241_s1, 32, %s464_s3, [#allocation3]   ;;  %200 = vbcast.lane.b32.xlu1 %v190_v33, 272  ;;  %192 = vbcast.lane.b32.xlu0 %v190_v33, 256  ;;  %v208_v34 = vsub.s32 1, %v188_v30  ;;  %vm225_vm4 = vcmask 7168  }
 0x1e1   :  { %v209_v35 = vrot.slane %v324_v32, %v208_v34 }
 0x1e3   :  { %204 = vbcast.lane.b32.xlu1 %v190_v33, 280  ;;  %196 = vbcast.lane.b32.xlu0 %v190_v33, 264 }
 0x1e7   :  { %215 = vbcast.lane.b32.xlu1 %v209_v35, 264  ;;  %211 = vbcast.lane.b32.xlu0 %v209_v35, 256 }
 0x1eb   :  { %223 = vbcast.lane.b32.xlu1 %v209_v35, 280  ;;  %219 = vbcast.lane.b32.xlu0 %v209_v35, 272 }
 0x251   :  { %v201_v36 = vpop.permute.xlu1 %200  ;;  %v193_v37 = vpop.permute.xlu0 %192 }
 0x252   :  { %228 = vst.msk [vmem:[%s465_s4 + $0x10] sm:$0xff] %vm225_vm4, %v201_v36  ;;  %226 = vst.msk [vmem:[%s465_s4] sm:$0xff] %vm225_vm4, %v193_v37 }
 0x255   :  { %v205_v38 = vpop.permute.xlu1 %204  ;;  %v197_v39 = vpop.permute.xlu0 %196 }
 0x256   :  { %229 = vst.msk [vmem:[%s465_s4 + $0x18] sm:$0xff] %vm225_vm4, %v205_v38  ;;  %227 = vst.msk [vmem:[%s465_s4 + $0x8] sm:$0xff] %vm225_vm4, %v197_v39 }
 0x259   :  { %v216_v40 = vpop.permute.xlu1 %215  ;;  %v212_v41 = vpop.permute.xlu0 %211 }
 0x25a   :  { %231 = vst.msk [vmem:[%s465_s4 + $0x28] sm:$0xff] %vm225_vm4, %v216_v40  ;;  %230 = vst.msk [vmem:[%s465_s4 + $0x20] sm:$0xff] %vm225_vm4, %v212_v41 }
 0x25d   :  { %v224_v42 = vpop.permute.xlu1 %223  ;;  %v220_v43 = vpop.permute.xlu0 %219 }
 0x25e   :  { %233 = vst.msk [vmem:[%s465_s4 + $0x38] sm:$0xff] %vm225_vm4, %v224_v42  ;;  %232 = vst.msk [vmem:[%s465_s4 + $0x30] sm:$0xff] %vm225_vm4, %v220_v43 }
 0x25f   :  { %347 = dma.done.wait [#allocation3], 32  }
 0x260   :  { %348 = vsyncadd [#allocation3], 4294967264 }
 0x261   :  { %251 = vsyncpa [#allocation3], 1 }

</bundles_post_ra>
